<compile_context>
chip_gen: v5e
topology: v5e:2x2
jax: 0.10.0
libtpu: 0.0.40
codegen_flags: <defaults>
</compile_context>

<pallas_src>
import jax
import jax.numpy as jnp
from jax import lax
from jax.experimental import pallas as pl
from jax.experimental.pallas import tpu as pltpu


def _round_up(a, m):
    return ((a + m - 1) // m) * m


def _mlp_kernel(x_ref, w1t_ref, b1_ref, w2_ref, b2_ref, o_ref, acc_ref):
    j = pl.program_id(1)

    @pl.when(j == 0)
    def _():
        acc_ref[...] = jnp.zeros_like(acc_ref)

    # First layer: (tH, d_in) x (TB, d_in) contracted on d_in -> (tH, TB).
    # MXU trans-B path; f32 accumulation.
    h = lax.dot_general(
        w1t_ref[...], x_ref[...],
        dimension_numbers=(((1,), (1,)), ((), ())),
        preferred_element_type=jnp.float32,
    )
    h = h + b1_ref[...]                      # (tH, 1) broadcasts over the lane axis
    # LeakyReLU, PyTorch default negative_slope = 0.01, f32 on the VPU.
    h = jnp.where(h > 0, h, 0.01 * h)
    # Second layer (output_dimension == 1): VPU multiply + sublane reduce instead
    # of a wasteful 1-column MXU matmul; accumulate partial sums over hidden tiles.
    acc_ref[...] += jnp.sum(h * w2_ref[...], axis=0, keepdims=True)   # (1, TB)

    @pl.when(j == pl.num_programs(1) - 1)
    def _():
        o_ref[...] = (acc_ref[...] + b2_ref[0, 0]).astype(o_ref.dtype)


def neural_network_forward(x, w1, b1, w2, b2, *, use_bf16=True,
                           block_b=None, block_h=None):
    """Fused MLP forward pass.

    x  : (B, D_in)
    w1 : (D_in, H),  b1 : (1, H) or (H,)
    w2 : (H, 1),     b2 : (1, 1) or (1,)
    returns (B, 1)
    """
    B, d_in = x.shape
    H = w1.shape[1]
    assert w2.shape[-1] == 1, "kernel implements the module default output_dimension=1"

    itemsize = 2 if use_bf16 else 4
    cdt = jnp.bfloat16 if use_bf16 else jnp.float32

    # ---------- batch tile (lane axis): adaptive to d_in, multiple of 128 ----------
    b_lane = _round_up(B, 128)
    if block_b is None:
        tb = _round_up(max((4 << 20) // max(d_in * itemsize, 1), 1), 128)
        tb = max(512, min(tb, 8192))
        if tb >= b_lane:
            # Small batch: collapse, but keep >=2 grid steps when possible so the
            # "parallel" batch axis can feed both TensorCores on v7x.
            tb = _round_up(b_lane // 2, 128) if b_lane >= 256 else b_lane
    else:
        tb = max(128, (min(block_b, b_lane) // 128) * 128)   # force lane-dense tiles
    b_pad = _round_up(b_lane, tb)
    nb = b_pad // tb

    # ---------- hidden tile: bound W1^T block + (tH, TB) f32 intermediate ----------
    if block_h is None:
        th = _round_up(H, 8)
        max_th = min((8 << 20) // max(d_in * itemsize, 1),
                     (8 << 20) // (tb * 4))
        max_th = max(256, (max_th // 128) * 128)
        th = min(th, max_th)
    else:
        th = max(8, (block_h // 8) * 8)
    h_pad = _round_up(_round_up(H, 8), th)
    nh = h_pad // th

    # ---------- one-time parameter plumbing (tiny vs. x traffic) ----------
    w1t = jnp.asarray(w1, jnp.float32).T                    # (H, D_in)
    b1_c = jnp.asarray(b1, jnp.float32).reshape(H, 1)
    w2_c = jnp.asarray(w2, jnp.float32).reshape(H, 1)
    b2_s = jnp.asarray(b2, jnp.float32).reshape(1, 1)
    if h_pad != H:                                          # zero-pad: contributes 0
        w1t = jnp.pad(w1t, ((0, h_pad - H), (0, 0)))
        b1_c = jnp.pad(b1_c, ((0, h_pad - H), (0, 0)))
        w2_c = jnp.pad(w2_c, ((0, h_pad - H), (0, 0)))
    w1t = w1t.astype(cdt)

    # x stays in its natural (B, D_in) layout: only a (fused) pad + cast, no x.T.
    x_p = x if b_pad == B else jnp.pad(x, ((0, b_pad - B), (0, 0)))
    x_p = x_p.astype(cdt)

    cost = pl.CostEstimate(
        flops=2 * b_pad * h_pad * (d_in + 1),
        transcendentals=0,
        bytes_accessed=(b_pad * d_in * itemsize + h_pad * d_in * itemsize
                        + 2 * h_pad * 4 + 4 + b_pad * 4),
    )

    def _build(single_buffer_weights):
        resident = single_buffer_weights and (nh == 1)

        def wspec(shape, imap):
            if resident:
                # Constant-index blocks are fetched once; don't allocate a dead
                # second buffer.
                return pl.BlockSpec(shape, imap, pipeline_mode=pl.Buffered(1))
            return pl.BlockSpec(shape, imap)

        return pl.pallas_call(
            _mlp_kernel,
            out_shape=jax.ShapeDtypeStruct((1, b_pad), jnp.float32),
            grid_spec=pltpu.PrefetchScalarGridSpec(
                num_scalar_prefetch=0,
                grid=(nb, nh),
                in_specs=[
                    pl.BlockSpec((tb, d_in), lambda i, j: (i, 0)),     # x tile (pipelined)
                    wspec((th, d_in), lambda i, j: (j, 0)),            # W1^T tile
                    wspec((th, 1), lambda i, j: (j, 0)),               # b1 tile
                    wspec((th, 1), lambda i, j: (j, 0)),               # w2 tile
                    pl.BlockSpec(memory_space=pltpu.MemorySpace.SMEM),  # b2 scalar
                ],
                out_specs=pl.BlockSpec((1, tb), lambda i, j: (0, i)),  # lane-dense out
                scratch_shapes=[pltpu.VMEM((1, tb), jnp.float32)],     # layer-2 accumulator
            ),
            compiler_params=pltpu.CompilerParams(
                dimension_semantics=("parallel", "arbitrary"),
                vmem_limit_bytes=64 << 20,
            ),
            cost_estimate=cost,
        )

    try:
        out_t = _build(True)(x_p, w1t, b1_c, w2_c, b2_s)
    except Exception:
        # This JAX build doesn't accept pipeline_mode on pallas_call BlockSpecs;
        # fall back to default double buffering (correctness identical).
        out_t = _build(False)(x_p, w1t, b1_c, w2_c, b2_s)

    # (1, b_pad) -> (b_pad, 1) is a pure reshape; slice away padding.
    return out_t.reshape(b_pad, 1)[:B].astype(x.dtype)


def init_params(key, input_dim, hidden_dim, output_dim=1):
    """Deterministic PyTorch-style Linear init (uniform(-1/sqrt(fan_in), +))."""
    k1, k2, k3, k4 = jax.random.split(key, 4)
    bound1 = 1.0 / jnp.sqrt(jnp.float32(input_dim))
    bound2 = 1.0 / jnp.sqrt(jnp.float32(hidden_dim))
    w1 = jax.random.uniform(k1, (input_dim, hidden_dim), jnp.float32, -bound1, bound1)
    b1 = jax.random.uniform(k2, (1, hidden_dim), jnp.float32, -bound1, bound1)
    w2 = jax.random.uniform(k3, (hidden_dim, output_dim), jnp.float32, -bound2, bound2)
    b2 = jax.random.uniform(k4, (1, output_dim), jnp.float32, -bound2, bound2)
    return w1, b1, w2, b2


def reference_forward(x, w1, b1, w2, b2):
    h = x @ w1 + b1
    h = jnp.where(h > 0, h, 0.01 * h)
    return h @ w2 + b2


if __name__ == "__main__":
    key = jax.random.PRNGKey(0)

    # ---- Test 1: module-default small shapes, exact f32 path ----
    batch, input_dim, hidden_dim = 8, 16, 32
    k_x, k_p, key = jax.random.split(key, 3)
    x = jax.random.normal(k_x, (batch, input_dim), dtype=jnp.float32)
    w1, b1, w2, b2 = init_params(k_p, input_dim, hidden_dim)
    ref = reference_forward(x, w1, b1, w2, b2)

    out_f32 = jax.block_until_ready(
        neural_network_forward(x, w1, b1, w2, b2, use_bf16=False))
    assert out_f32.shape == (batch, 1), out_f32.shape
    assert jnp.allclose(out_f32, ref, atol=1e-5, rtol=1e-5), "f32 mismatch vs reference"

    # Default path: bf16 operands, f32 accumulation (tolerance-aware check).
    out_bf16 = jax.block_until_ready(neural_network_forward(x, w1, b1, w2, b2))
    assert jnp.allclose(out_bf16, ref, atol=5e-2, rtol=5e-2), "bf16 mismatch vs reference"

    # ---- Test 2: ragged batch + ragged hidden (exercises padding + 2 batch tiles) ----
    batch2, in2, hid2 = 300, 24, 100
    k_x2, k_p2, key = jax.random.split(key, 3)
    x2 = jax.random.normal(k_x2, (batch2, in2), dtype=jnp.float32)
    p2 = init_params(k_p2, in2, hid2)
    ref2 = reference_forward(x2, *p2)
    out2 = jax.block_until_ready(
        neural_network_forward(x2, *p2, use_bf16=False))
    assert out2.shape == (batch2, 1), out2.shape
    assert jnp.allclose(out2, ref2, atol=1e-4, rtol=1e-4), "padded-shape mismatch"

    # ---- Test 3: force hidden-dimension blocking (accumulator path, nh > 1) ----
    batch3, in3, hid3 = 8, 16, 64
    k_x3, k_p3, key = jax.random.split(key, 3)
    x3 = jax.random.normal(k_x3, (batch3, in3), dtype=jnp.float32)
    p3 = init_params(k_p3, in3, hid3)
    ref3 = reference_forward(x3, *p3)
    out3 = jax.block_until_ready(
        neural_network_forward(x3, *p3, use_bf16=False, block_h=32))
    assert jnp.allclose(out3, ref3, atol=1e-4, rtol=1e-4), "H-blocked mismatch"

    print("KERNEL_OK")
</pallas_src>

<mosaic_0001>
module attributes {stable_mosaic.version = 11 : i64} {
  func.func @_mlp_kernel(%arg0: i32, %arg1: i32, %arg2: memref<128x16xf32, #tpu.memory_space<vmem>>, %arg3: memref<32x16xf32, #tpu.memory_space<vmem>>, %arg4: memref<32x1xf32, #tpu.memory_space<vmem>>, %arg5: memref<32x1xf32, #tpu.memory_space<vmem>>, %arg6: memref<1x1xf32, #tpu.memory_space<smem>>, %arg7: memref<1x128xf32, #tpu.memory_space<vmem>>, %arg8: memref<1x128xf32, #tpu.memory_space<vmem>>) attributes {dimension_semantics = [#tpu.dimension_semantics<parallel>, #tpu.dimension_semantics<arbitrary>], iteration_bounds = array<i64: 1, 1>, scalar_prefetch = 0 : i64, scratch_operands = 1 : i64, tpu.core_type = #tpu.core_type<tc>, window_params = [{transform_indices = @transform_0, window_bounds = array<i64: 128, 16>}, {pipeline_mode = #tpu.pipeline_mode<synchronous>, transform_indices = @transform_1, window_bounds = array<i64: 32, 16>}, {pipeline_mode = #tpu.pipeline_mode<synchronous>, transform_indices = @transform_2, window_bounds = array<i64: 32, 1>}, {pipeline_mode = #tpu.pipeline_mode<synchronous>, transform_indices = @transform_3, window_bounds = array<i64: 32, 1>}, {transform_indices = @transform_4, window_bounds = array<i64: 1, 1>}, {transform_indices = @transform_5, window_bounds = array<i64: 1, 128>}]} {
    %c0_i32 = arith.constant 0 : i32
    %0 = arith.cmpi eq, %arg1, %c0_i32 : i32
    %1 = arith.extui %0 : i1 to i32
    %c0_i32_0 = arith.constant 0 : i32
    %2 = arith.cmpi ne, %1, %c0_i32_0 : i32
    scf.if %2 {
      %cst_17 = arith.constant 0.000000e+00 : f32
      %25 = vector.broadcast %cst_17 : f32 to vector<1x128xf32>
      %c0_18 = arith.constant 0 : index
      %c0_19 = arith.constant 0 : index
      %26 = vector.load %arg8[%c0_18, %c0_19] : memref<1x128xf32, #tpu.memory_space<vmem>>, vector<1x128xf32>
      tpu.vector_store %arg8[%c0_18, %c0_19], %25 {strides = array<i32>} : memref<1x128xf32, #tpu.memory_space<vmem>>, vector<1x128xf32>,
    } else {
    }
    %c0 = arith.constant 0 : index
    %c0_1 = arith.constant 0 : index
    %3 = vector.load %arg3[%c0, %c0_1] : memref<32x16xf32, #tpu.memory_space<vmem>>, vector<32x16xf32>
    %c0_2 = arith.constant 0 : index
    %c0_3 = arith.constant 0 : index
    %4 = vector.load %arg2[%c0_2, %c0_3] : memref<128x16xf32, #tpu.memory_space<vmem>>, vector<128x16xf32>
    %cst = arith.constant dense<0.000000e+00> : vector<32x128xf32>
    %5 = tpu.matmul %3, %4, %cst {dimension_numbers = #tpu.dot_dimension_numbers<[1], [1], [0], [0], [0, 0, 1, 0], [], []>} : vector<32x16xf32>, vector<128x16xf32>, vector<32x128xf32> -> vector<32x128xf32>
    %c0_4 = arith.constant 0 : index
    %c0_5 = arith.constant 0 : index
    %6 = vector.load %arg4[%c0_4, %c0_5] : memref<32x1xf32, #tpu.memory_space<vmem>>, vector<32x1xf32>
    %7 = vector.broadcast %6 : vector<32x1xf32> to vector<32x128xf32>
    %8 = arith.addf %5, %7 : vector<32x128xf32>
    %cst_6 = arith.constant 0.000000e+00 : f32
    %9 = vector.broadcast %cst_6 : f32 to vector<32x128xf32>
    %10 = arith.cmpf ogt, %8, %9 : vector<32x128xf32>
    %cst_7 = arith.constant 0.00999999977 : f32
    %11 = vector.broadcast %cst_7 : f32 to vector<32x128xf32>
    %12 = arith.mulf %11, %8 : vector<32x128xf32>
    %13 = arith.select %10, %8, %12 : vector<32x128xi1>, vector<32x128xf32>
    %c0_8 = arith.constant 0 : index
    %c0_9 = arith.constant 0 : index
    %14 = vector.load %arg8[%c0_8, %c0_9] : memref<1x128xf32, #tpu.memory_space<vmem>>, vector<1x128xf32>
    %c0_10 = arith.constant 0 : index
    %c0_11 = arith.constant 0 : index
    %15 = vector.load %arg5[%c0_10, %c0_11] : memref<32x1xf32, #tpu.memory_space<vmem>>, vector<32x1xf32>
    %16 = vector.broadcast %15 : vector<32x1xf32> to vector<32x128xf32>
    %17 = arith.mulf %13, %16 : vector<32x128xf32>
    %cst_12 = arith.constant dense<0.000000e+00> : vector<128xf32>
    %18 = vector.multi_reduction <add>, %17, %cst_12 [0] : vector<32x128xf32> to vector<128xf32>
    %19 = vector.shape_cast %18 : vector<128xf32> to vector<1x128xf32>
    %20 = arith.addf %14, %19 : vector<1x128xf32>
    %c0_13 = arith.constant 0 : index
    %c0_14 = arith.constant 0 : index
    %21 = vector.load %arg8[%c0_13, %c0_14] : memref<1x128xf32, #tpu.memory_space<vmem>>, vector<1x128xf32>
    tpu.vector_store %arg8[%c0_13, %c0_14], %20 {strides = array<i32>} : memref<1x128xf32, #tpu.memory_space<vmem>>, vector<1x128xf32>,
    %c0_i32_15 = arith.constant 0 : i32
    %22 = arith.cmpi eq, %arg1, %c0_i32_15 : i32
    %23 = arith.extui %22 : i1 to i32
    %c0_i32_16 = arith.constant 0 : i32
    %24 = arith.cmpi ne, %23, %c0_i32_16 : i32
    scf.if %24 {
      %c0_17 = arith.constant 0 : index
      %c0_18 = arith.constant 0 : index
      %25 = vector.load %arg8[%c0_17, %c0_18] : memref<1x128xf32, #tpu.memory_space<vmem>>, vector<1x128xf32>
      %c0_19 = arith.constant 0 : index
      %c0_20 = arith.constant 0 : index
      %26 = memref.load %arg6[%c0_19, %c0_20] : memref<1x1xf32, #tpu.memory_space<smem>>
      %27 = vector.broadcast %26 : f32 to vector<1x128xf32>
      %28 = arith.addf %25, %27 : vector<1x128xf32>
      %c0_21 = arith.constant 0 : index
      %c0_22 = arith.constant 0 : index
      %29 = vector.load %arg7[%c0_21, %c0_22] : memref<1x128xf32, #tpu.memory_space<vmem>>, vector<1x128xf32>
      tpu.vector_store %arg7[%c0_21, %c0_22], %28 {strides = array<i32>} : memref<1x128xf32, #tpu.memory_space<vmem>>, vector<1x128xf32>,
    } else {
    }
    return
  }
  func.func @transform_0(%arg0: i32, %arg1: i32) -> (i32, i32) {
    %c0_i32 = arith.constant 0 : i32
    %c0_i32_0 = arith.constant 0 : i32
    return %arg0, %c0_i32 : i32, i32
  }
  func.func @transform_1(%arg0: i32, %arg1: i32) -> (i32, i32) {
    %c0_i32 = arith.constant 0 : i32
    %c0_i32_0 = arith.constant 0 : i32
    return %arg1, %c0_i32 : i32, i32
  }
  func.func @transform_2(%arg0: i32, %arg1: i32) -> (i32, i32) {
    %c0_i32 = arith.constant 0 : i32
    %c0_i32_0 = arith.constant 0 : i32
    return %arg1, %c0_i32 : i32, i32
  }
  func.func @transform_3(%arg0: i32, %arg1: i32) -> (i32, i32) {
    %c0_i32 = arith.constant 0 : i32
    %c0_i32_0 = arith.constant 0 : i32
    return %arg1, %c0_i32 : i32, i32
  }
  func.func @transform_4(%arg0: i32, %arg1: i32) -> (i32, i32) {
    %c0_i32 = arith.constant 0 : i32
    %c0_i32_0 = arith.constant 0 : i32
    %c0_i32_1 = arith.constant 0 : i32
    return %c0_i32, %c0_i32_0 : i32, i32
  }
  func.func @transform_5(%arg0: i32, %arg1: i32) -> (i32, i32) {
    %c0_i32 = arith.constant 0 : i32
    %c0_i32_0 = arith.constant 0 : i32
    return %c0_i32, %arg0 : i32, i32
  }
}

module attributes {stable_mosaic.version = 11 : i64} {
  func.func @_mlp_kernel(%arg0: i32, %arg1: i32, %arg2: memref<128x16xf32, #tpu.memory_space<vmem>>, %arg3: memref<32x16xf32, #tpu.memory_space<vmem>>, %arg4: memref<32x1xf32, #tpu.memory_space<vmem>>, %arg5: memref<32x1xf32, #tpu.memory_space<vmem>>, %arg6: memref<1x1xf32, #tpu.memory_space<smem>>, %arg7: memref<1x128xf32, #tpu.memory_space<vmem>>, %arg8: memref<1x128xf32, #tpu.memory_space<vmem>>) attributes {dimension_semantics = [#tpu.dimension_semantics<parallel>, #tpu.dimension_semantics<arbitrary>], iteration_bounds = array<i64: 1, 1>, scalar_prefetch = 0 : i64, scratch_operands = 1 : i64, tpu.core_type = #tpu.core_type<tc>, window_params = [{transform_indices = @transform_0, window_bounds = array<i64: 128, 16>}, {transform_indices = @transform_1, window_bounds = array<i64: 32, 16>}, {transform_indices = @transform_2, window_bounds = array<i64: 32, 1>}, {transform_indices = @transform_3, window_bounds = array<i64: 32, 1>}, {transform_indices = @transform_4, window_bounds = array<i64: 1, 1>}, {transform_indices = @transform_5, window_bounds = array<i64: 1, 128>}]} {
    %c0_i32 = arith.constant 0 : i32
    %0 = arith.cmpi eq, %arg1, %c0_i32 : i32
    %1 = arith.extui %0 : i1 to i32
    %c0_i32_0 = arith.constant 0 : i32
    %2 = arith.cmpi ne, %1, %c0_i32_0 : i32
    scf.if %2 {
      %cst_17 = arith.constant 0.000000e+00 : f32
      %25 = vector.broadcast %cst_17 : f32 to vector<1x128xf32>
      %c0_18 = arith.constant 0 : index
      %c0_19 = arith.constant 0 : index
      %26 = vector.load %arg8[%c0_18, %c0_19] : memref<1x128xf32, #tpu.memory_space<vmem>>, vector<1x128xf32>
      tpu.vector_store %arg8[%c0_18, %c0_19], %25 {strides = array<i32>} : memref<1x128xf32, #tpu.memory_space<vmem>>, vector<1x128xf32>,
    } else {
    }
    %c0 = arith.constant 0 : index
    %c0_1 = arith.constant 0 : index
    %3 = vector.load %arg3[%c0, %c0_1] : memref<32x16xf32, #tpu.memory_space<vmem>>, vector<32x16xf32>
    %c0_2 = arith.constant 0 : index
    %c0_3 = arith.constant 0 : index
    %4 = vector.load %arg2[%c0_2, %c0_3] : memref<128x16xf32, #tpu.memory_space<vmem>>, vector<128x16xf32>
    %cst = arith.constant dense<0.000000e+00> : vector<32x128xf32>
    %5 = tpu.matmul %3, %4, %cst {dimension_numbers = #tpu.dot_dimension_numbers<[1], [1], [0], [0], [0, 0, 1, 0], [], []>} : vector<32x16xf32>, vector<128x16xf32>, vector<32x128xf32> -> vector<32x128xf32>
    %c0_4 = arith.constant 0 : index
    %c0_5 = arith.constant 0 : index
    %6 = vector.load %arg4[%c0_4, %c0_5] : memref<32x1xf32, #tpu.memory_space<vmem>>, vector<32x1xf32>
    %7 = vector.broadcast %6 : vector<32x1xf32> to vector<32x128xf32>
    %8 = arith.addf %5, %7 : vector<32x128xf32>
    %cst_6 = arith.constant 0.000000e+00 : f32
    %9 = vector.broadcast %cst_6 : f32 to vector<32x128xf32>
    %10 = arith.cmpf ogt, %8, %9 : vector<32x128xf32>
    %cst_7 = arith.constant 0.00999999977 : f32
    %11 = vector.broadcast %cst_7 : f32 to vector<32x128xf32>
    %12 = arith.mulf %11, %8 : vector<32x128xf32>
    %13 = arith.select %10, %8, %12 : vector<32x128xi1>, vector<32x128xf32>
    %c0_8 = arith.constant 0 : index
    %c0_9 = arith.constant 0 : index
    %14 = vector.load %arg8[%c0_8, %c0_9] : memref<1x128xf32, #tpu.memory_space<vmem>>, vector<1x128xf32>
    %c0_10 = arith.constant 0 : index
    %c0_11 = arith.constant 0 : index
    %15 = vector.load %arg5[%c0_10, %c0_11] : memref<32x1xf32, #tpu.memory_space<vmem>>, vector<32x1xf32>
    %16 = vector.broadcast %15 : vector<32x1xf32> to vector<32x128xf32>
    %17 = arith.mulf %13, %16 : vector<32x128xf32>
    %cst_12 = arith.constant dense<0.000000e+00> : vector<128xf32>
    %18 = vector.multi_reduction <add>, %17, %cst_12 [0] : vector<32x128xf32> to vector<128xf32>
    %19 = vector.shape_cast %18 : vector<128xf32> to vector<1x128xf32>
    %20 = arith.addf %14, %19 : vector<1x128xf32>
    %c0_13 = arith.constant 0 : index
    %c0_14 = arith.constant 0 : index
    %21 = vector.load %arg8[%c0_13, %c0_14] : memref<1x128xf32, #tpu.memory_space<vmem>>, vector<1x128xf32>
    tpu.vector_store %arg8[%c0_13, %c0_14], %20 {strides = array<i32>} : memref<1x128xf32, #tpu.memory_space<vmem>>, vector<1x128xf32>,
    %c0_i32_15 = arith.constant 0 : i32
    %22 = arith.cmpi eq, %arg1, %c0_i32_15 : i32
    %23 = arith.extui %22 : i1 to i32
    %c0_i32_16 = arith.constant 0 : i32
    %24 = arith.cmpi ne, %23, %c0_i32_16 : i32
    scf.if %24 {
      %c0_17 = arith.constant 0 : index
      %c0_18 = arith.constant 0 : index
      %25 = vector.load %arg8[%c0_17, %c0_18] : memref<1x128xf32, #tpu.memory_space<vmem>>, vector<1x128xf32>
      %c0_19 = arith.constant 0 : index
      %c0_20 = arith.constant 0 : index
      %26 = memref.load %arg6[%c0_19, %c0_20] : memref<1x1xf32, #tpu.memory_space<smem>>
      %27 = vector.broadcast %26 : f32 to vector<1x128xf32>
      %28 = arith.addf %25, %27 : vector<1x128xf32>
      %c0_21 = arith.constant 0 : index
      %c0_22 = arith.constant 0 : index
      %29 = vector.load %arg7[%c0_21, %c0_22] : memref<1x128xf32, #tpu.memory_space<vmem>>, vector<1x128xf32>
      tpu.vector_store %arg7[%c0_21, %c0_22], %28 {strides = array<i32>} : memref<1x128xf32, #tpu.memory_space<vmem>>, vector<1x128xf32>,
    } else {
    }
    return
  }
  func.func @transform_0(%arg0: i32, %arg1: i32) -> (i32, i32) {
    %c0_i32 = arith.constant 0 : i32
    %c0_i32_0 = arith.constant 0 : i32
    return %arg0, %c0_i32 : i32, i32
  }
  func.func @transform_1(%arg0: i32, %arg1: i32) -> (i32, i32) {
    %c0_i32 = arith.constant 0 : i32
    %c0_i32_0 = arith.constant 0 : i32
    return %arg1, %c0_i32 : i32, i32
  }
  func.func @transform_2(%arg0: i32, %arg1: i32) -> (i32, i32) {
    %c0_i32 = arith.constant 0 : i32
    %c0_i32_0 = arith.constant 0 : i32
    return %arg1, %c0_i32 : i32, i32
  }
  func.func @transform_3(%arg0: i32, %arg1: i32) -> (i32, i32) {
    %c0_i32 = arith.constant 0 : i32
    %c0_i32_0 = arith.constant 0 : i32
    return %arg1, %c0_i32 : i32, i32
  }
  func.func @transform_4(%arg0: i32, %arg1: i32) -> (i32, i32) {
    %c0_i32 = arith.constant 0 : i32
    %c0_i32_0 = arith.constant 0 : i32
    %c0_i32_1 = arith.constant 0 : i32
    return %c0_i32, %c0_i32_0 : i32, i32
  }
  func.func @transform_5(%arg0: i32, %arg1: i32) -> (i32, i32) {
    %c0_i32 = arith.constant 0 : i32
    %c0_i32_0 = arith.constant 0 : i32
    return %c0_i32, %arg0 : i32, i32
  }
}

</mosaic_0001>

<bundles_post_ra>
// kernel: tpu_custom_call.1
= control target key start
LH: loop header
LB: loop body
LE: loop exit
PB: predicated region body
PF: predicated region fallthrough
CT: control target
= control target key end

     0   :  { %vm71_vm0 = vcmask 130048   ;;  %s528_s0 = inlined_call_operand.vmem [shape: f32[128,16], index: 0, kind: input, shape index: {}]   ;;  %s529_s1 = inlined_call_operand.vmem [shape: f32[32,16], index: 1, kind: input, shape index: {}]   ;;  %s530_s2 = inlined_call_operand.vmem [shape: f32[32,1], index: 2, kind: input, shape index: {}]   ;;  %s531_s3 = inlined_call_operand.vmem [shape: f32[32,1], index: 3, kind: input, shape index: {}]   ;;  %s532_s4 = inlined_call_operand.<no memory space> [shape: f32[1,1], index: 4, kind: input, shape index: {}]   ;;  %s533_s5 = inlined_call_operand.hbm [shape: f32[1,128], index: 5, kind: output, shape index: {}]  }
   0x1   :  { %v46_v0 = vld [vmem:[%s528_s0 + $0x78] sm:$0xff]  ;;  %v45_v1 = vld [vmem:[%s528_s0 + $0x70] sm:$0xff] }
   0x2   :  { %237 = vmatpush.xpose.msk.msra.mxu0 %vm71_vm0, %v46_v0  ;;  %257 = vmatpush.xpose.msk.msra.mxu1 %vm71_vm0, %v46_v0 }
   0x3   :  { %258 = vmatpush.xpose.msk.msra.mxu2 %vm71_vm0, %v46_v0  ;;  %259 = vmatpush.xpose.msk.msra.mxu3 %vm71_vm0, %v46_v0 }
   0x4   :  { %11 = vsyncpa [#allocation5], 0  ;;  %v44_v2 = vld [vmem:[%s528_s0 + $0x68] sm:$0xff]  ;;  %v43_v3 = vld [vmem:[%s528_s0 + $0x60] sm:$0xff]  ;;  %v337_v6 = vmov 0   ;;  %v338_v29 = vmov 0.0  }
   0x5   :  { %v42_v4 = vld [vmem:[%s528_s0 + $0x58] sm:$0xff]  ;;  %v41_v5 = vld [vmem:[%s528_s0 + $0x50] sm:$0xff]  ;;  %308 = vset.pattern.permute.xlu0 %v337_v6  ;;  %309 = vset.pattern.permute.xlu1 %v337_v6  ;;  %v40_v7 = vld [vmem:[%s528_s0 + $0x48] sm:$0xff]  ;;  %26 = vst [vmem:[#allocation2] sm:$0x1] %v338_v29  ;;  %s339_s22 = smov [#allocation4]  }
   0x6   :  { %238 = vmatpush.xpose.msk.msra.mxu0 %vm71_vm0, %v45_v1  ;;  %260 = vmatpush.xpose.msk.msra.mxu1 %vm71_vm0, %v45_v1  ;;  %v47_v8 = vld [vmem:[%s530_s2] sm:$0xff]  ;;  %v49_v9 = vld [vmem:[%s530_s2 + $0x10] sm:$0xff]  ;;  %v38_v11 = vld [vmem:[%s528_s0 + $0x38] sm:$0xff]  ;;  %s228_s25 = sshll.u32 %s533_s5, 4  ;;  %s229_s25 = int_to_ptr.hbm [resolvable:$true] %s228_s25 }
   0x7   :  { %261 = vmatpush.xpose.msk.msra.mxu2 %vm71_vm0, %v45_v1  ;;  %262 = vmatpush.xpose.msk.msra.mxu3 %vm71_vm0, %v45_v1  ;;  %v39_v10 = vld [vmem:[%s528_s0 + $0x40] sm:$0xff]  ;;  %v48_v12 = vld [vmem:[%s530_s2 + $0x8] sm:$0xff]  ;;  %v50_v13 = vld [vmem:[%s530_s2 + $0x18] sm:$0xff]  ;;  %s226_s2 = sshll.u32 %s339_s22, 4  ;;  %s227_s2 = int_to_ptr.vmem [resolvable:$true] %s226_s2 }
   0x8   :  { %310 = vset.pattern.permute.xlu2 %v337_v6  ;;  %53 = vperm.xlu0 %308, %v47_v8   ;;  %v174_v14 = vld [vmem:[%s531_s3] sm:$0xff]  ;;  %v37_v15 = vld [vmem:[%s528_s0 + $0x30] sm:$0xff]  ;;  %v177_v17 = vld [vmem:[%s531_s3 + $0x18] sm:$0xff] }
   0x9   :  { %63 = vperm.xlu1 %309, %v49_v9   ;;  %180 = vperm.xlu2 %310, %v174_v14   ;;  %v176_v16 = vld [vmem:[%s531_s3 + $0x10] sm:$0xff]  ;;  %v36_v18 = vld [vmem:[%s528_s0 + $0x28] sm:$0xff]  ;;  %v35_v20 = vld [vmem:[%s528_s0 + $0x20] sm:$0xff] }
   0xa   :  { %239 = vmatpush.xpose.msk.msra.mxu0 %vm71_vm0, %v44_v2  ;;  %263 = vmatpush.xpose.msk.msra.mxu1 %vm71_vm0, %v44_v2  ;;  %v175_v19 = vld [vmem:[%s531_s3 + $0x8] sm:$0xff]  ;;  %v34_v21 = vld [vmem:[%s528_s0 + $0x18] sm:$0xff]  ;;  %v33_v22 = vld [vmem:[%s528_s0 + $0x10] sm:$0xff] }
   0xb   :  { %264 = vmatpush.xpose.msk.msra.mxu2 %vm71_vm0, %v44_v2  ;;  %265 = vmatpush.xpose.msk.msra.mxu3 %vm71_vm0, %v44_v2  ;;  %v32_v23 = vld [vmem:[%s528_s0 + $0x8] sm:$0xff]  ;;  %v31_v24 = vld [vmem:[%s528_s0] sm:$0xff]  ;;  %v29_v27 = vld [vmem:[%s529_s1 + $0x10] sm:$0xff] }
   0xc   :  { %v27_v25 = vld [vmem:[%s529_s1] sm:$0xff]  ;;  %v28_v26 = vld [vmem:[%s529_s1 + $0x8] sm:$0xff]  ;;  %v30_v28 = vld [vmem:[%s529_s1 + $0x18] sm:$0xff] }
   0xd   :  { %v173_v2 = vld [vmem:[#allocation2] sm:$0x1] }
   0xe   :  { %240 = vmatpush.xpose.msk.msra.mxu0 %vm71_vm0, %v43_v3  ;;  %266 = vmatpush.xpose.msk.msra.mxu1 %vm71_vm0, %v43_v3 }
   0xf   :  { %267 = vmatpush.xpose.msk.msra.mxu2 %vm71_vm0, %v43_v3  ;;  %268 = vmatpush.xpose.msk.msra.mxu3 %vm71_vm0, %v43_v3 }
  0x10   :  { %58 = vperm.xlu0 %308, %v48_v12  }
  0x11   :  { %68 = vperm.xlu1 %309, %v50_v13   ;;  %185 = vperm.xlu2 %310, %v175_v19  }
  0x12   :  { %241 = vmatpush.xpose.msk.msra.mxu0 %vm71_vm0, %v42_v4  ;;  %269 = vmatpush.xpose.msk.msra.mxu1 %vm71_vm0, %v42_v4 }
  0x13   :  { %270 = vmatpush.xpose.msk.msra.mxu2 %vm71_vm0, %v42_v4  ;;  %271 = vmatpush.xpose.msk.msra.mxu3 %vm71_vm0, %v42_v4 }
  0x16   :  { %242 = vmatpush.xpose.msk.msra.mxu0 %vm71_vm0, %v41_v5  ;;  %272 = vmatpush.xpose.msk.msra.mxu1 %vm71_vm0, %v41_v5 }
  0x17   :  { %273 = vmatpush.xpose.msk.msra.mxu2 %vm71_vm0, %v41_v5  ;;  %274 = vmatpush.xpose.msk.msra.mxu3 %vm71_vm0, %v41_v5  ;;  %v218_v5 = vstv %s532_s4 }
  0x18   :  { %190 = vperm.xlu0 %308, %v176_v16  }
  0x19   :  { %195 = vperm.xlu1 %309, %v177_v17  }
  0x1a   :  { %243 = vmatpush.xpose.msk.msra.mxu0 %vm71_vm0, %v40_v7  ;;  %275 = vmatpush.xpose.msk.msra.mxu1 %vm71_vm0, %v40_v7 }
  0x1b   :  { %276 = vmatpush.xpose.msk.msra.mxu2 %vm71_vm0, %v40_v7  ;;  %277 = vmatpush.xpose.msk.msra.mxu3 %vm71_vm0, %v40_v7 }
  0x1e   :  { %244 = vmatpush.xpose.msk.msra.mxu0 %vm71_vm0, %v39_v10  ;;  %278 = vmatpush.xpose.msk.msra.mxu1 %vm71_vm0, %v39_v10 }
  0x1f   :  { %279 = vmatpush.xpose.msk.msra.mxu2 %vm71_vm0, %v39_v10  ;;  %280 = vmatpush.xpose.msk.msra.mxu3 %vm71_vm0, %v39_v10 }
  0x22   :  { %245 = vmatpush.xpose.msk.msra.mxu0 %vm71_vm0, %v38_v11  ;;  %281 = vmatpush.xpose.msk.msra.mxu1 %vm71_vm0, %v38_v11 }
  0x23   :  { %282 = vmatpush.xpose.msk.msra.mxu2 %vm71_vm0, %v38_v11  ;;  %283 = vmatpush.xpose.msk.msra.mxu3 %vm71_vm0, %v38_v11 }
  0x26   :  { %246 = vmatpush.xpose.msk.msra.mxu0 %vm71_vm0, %v37_v15  ;;  %284 = vmatpush.xpose.msk.msra.mxu1 %vm71_vm0, %v37_v15 }
  0x27   :  { %285 = vmatpush.xpose.msk.msra.mxu2 %vm71_vm0, %v37_v15  ;;  %286 = vmatpush.xpose.msk.msra.mxu3 %vm71_vm0, %v37_v15 }
  0x2a   :  { %247 = vmatpush.xpose.msk.msra.mxu0 %vm71_vm0, %v36_v18  ;;  %287 = vmatpush.xpose.msk.msra.mxu1 %vm71_vm0, %v36_v18 }
  0x2b   :  { %288 = vmatpush.xpose.msk.msra.mxu2 %vm71_vm0, %v36_v18  ;;  %289 = vmatpush.xpose.msk.msra.mxu3 %vm71_vm0, %v36_v18 }
  0x2e   :  { %248 = vmatpush.xpose.msk.msra.mxu0 %vm71_vm0, %v35_v20  ;;  %290 = vmatpush.xpose.msk.msra.mxu1 %vm71_vm0, %v35_v20 }
  0x2f   :  { %291 = vmatpush.xpose.msk.msra.mxu2 %vm71_vm0, %v35_v20  ;;  %292 = vmatpush.xpose.msk.msra.mxu3 %vm71_vm0, %v35_v20 }
  0x32   :  { %249 = vmatpush.xpose.msk.msra.mxu0 %vm71_vm0, %v34_v21  ;;  %293 = vmatpush.xpose.msk.msra.mxu1 %vm71_vm0, %v34_v21 }
  0x33   :  { %294 = vmatpush.xpose.msk.msra.mxu2 %vm71_vm0, %v34_v21  ;;  %295 = vmatpush.xpose.msk.msra.mxu3 %vm71_vm0, %v34_v21 }
  0x36   :  { %250 = vmatpush.xpose.msk.msra.mxu0 %vm71_vm0, %v33_v22  ;;  %296 = vmatpush.xpose.msk.msra.mxu1 %vm71_vm0, %v33_v22 }
  0x37   :  { %297 = vmatpush.xpose.msk.msra.mxu2 %vm71_vm0, %v33_v22  ;;  %298 = vmatpush.xpose.msk.msra.mxu3 %vm71_vm0, %v33_v22 }
  0x3a   :  { %251 = vmatpush.xpose.msk.msra.mxu0 %vm71_vm0, %v32_v23  ;;  %299 = vmatpush.xpose.msk.msra.mxu1 %vm71_vm0, %v32_v23 }
  0x3b   :  { %300 = vmatpush.xpose.msk.msra.mxu2 %vm71_vm0, %v32_v23  ;;  %301 = vmatpush.xpose.msk.msra.mxu3 %vm71_vm0, %v32_v23 }
  0x3e   :  { %252 = vmatpush.xpose.msk.msra.mxu0 %vm71_vm0, %v31_v24  ;;  %302 = vmatpush.xpose.msk.msra.mxu1 %vm71_vm0, %v31_v24 }
  0x3f   :  { %303 = vmatpush.xpose.msk.msra.mxu2 %vm71_vm0, %v31_v24  ;;  %304 = vmatpush.xpose.msk.msra.mxu3 %vm71_vm0, %v31_v24 }
  0x41   :  { %253 = vmatmul.msk.f32.vlgmr.msra.gmra.mxu0 %vm71_vm0, %v27_v25  ;;  %254 = vmatmul.msk.f32.vlgmr.msra.gmra.mxu1 %vm71_vm0, %v28_v26 }
  0x42   :  { %255 = vmatmul.msk.f32.vlgmr.msra.gmra.mxu2 %vm71_vm0, %v29_v27  ;;  %256 = vmatmul.msk.f32.vlgmr.msra.gmra.mxu3 %vm71_vm0, %v30_v28 }
  0x63   :  { %v181_v32 = vpop.permute.xlu2 %180 }
  0x6b   :  { %v186_v45 = vpop.permute.xlu2 %185 }
  0x7a   :  { %v54_v30 = vpop.permute.xlu0 %53 }
  0x7b   :  { %v64_v31 = vpop.permute.xlu1 %63 }
  0x82   :  { %v59_v33 = vpop.permute.xlu0 %58 }
  0x83   :  { %v69_v40 = vpop.permute.xlu1 %68 }
  0x8a   :  { %v191_v52 = vpop.permute.xlu0 %190 }
  0x8b   :  { %v196_v57 = vpop.permute.xlu1 %195 }
  0xbe   :  { %v149_v34 = vpop.f32.mrf.mxu0  ;;  %v152_v35 = vpop.f32.mrf.mxu1 }
  0xbf   :  { %v150_v36 = vadd.f32 %v149_v34, %v54_v30  ;;  %v153_v37 = vadd.f32 %v152_v35, %v59_v33 }
  0xc1   :  { %vm161_vm1 = vcmp.gt.f32.partialorder %v150_v36, 0.0  ;;  %v165_v38 = vmul.f32 0.01, %v150_v36  ;;  %v166_v39 = vmul.f32 0.01, %v153_v37  ;;  %vm162_vm2 = vcmp.gt.f32.partialorder %v153_v37, 0.0 }
  0xc3   :  { %v169_v41 = vsel %vm161_vm1, %v150_v36, %v165_v38  ;;  %v170_v42 = vsel %vm162_vm2, %v153_v37, %v166_v39 }
  0xc4   :  { %v198_v48 = vmul.f32 %v181_v32, %v169_v41  ;;  %v199_v49 = vmul.f32 %v186_v45, %v170_v42 }
  0xc5   :  { %v155_v43 = vpop.f32.mrf.mxu2  ;;  %v158_v44 = vpop.f32.mrf.mxu3 }
  0xc6   :  { %v156_v46 = vadd.f32 %v155_v43, %v64_v31  ;;  %v159_v47 = vadd.f32 %v158_v44, %v69_v40  ;;  %v202_v55 = vadd.f32 %v199_v49, %v198_v48 }
  0xc8   :  { %vm163_vm3 = vcmp.gt.f32.partialorder %v156_v46, 0.0  ;;  %v167_v50 = vmul.f32 0.01, %v156_v46  ;;  %vm164_vm4 = vcmp.gt.f32.partialorder %v159_v47, 0.0  ;;  %v168_v51 = vmul.f32 0.01, %v159_v47 }
  0xca   :  { %v171_v53 = vsel %vm163_vm3, %v156_v46, %v167_v50  ;;  %v172_v54 = vsel %vm164_vm4, %v159_v47, %v168_v51 }
  0xcb   :  { %v200_v56 = vmul.f32 %v191_v52, %v171_v53  ;;  %v201_v59 = vmul.f32 %v196_v57, %v172_v54 }
  0xcd   :  { %v203_v58 = vadd.f32 %v202_v55, %v200_v56 }
  0xcf   :  { %v204_v60 = vadd.f32 %v203_v58, %v201_v59 }
  0xd1   :  { %v205_v61 = vrot.slane %v204_v60, 4 }
  0xd3   :  { %v206_v62 = vadd.f32 %v205_v61, %v204_v60 }
  0xd5   :  { %v207_v63 = vrot.slane %v206_v62, 2 }
  0xd7   :  { %v208_v0 = vadd.f32 %v207_v63, %v206_v62 }
  0xd9   :  { %v209_v1 = vrot.slane %v208_v0, 1 }
  0xdb   :  { %v210_v3 = vadd.f32 %v209_v1, %v208_v0 }
  0xdd   :  { %v211_v4 = vadd.f32 %v210_v3, %v173_v2 }
  0xdf   :  { %212 = vst [vmem:[#allocation2] sm:$0x1] %v211_v4 }
  0xe6   :  { %v216_v6 = vld [vmem:[#allocation2] sm:$0x1] }
  0xe7   :  { %v219_v7 = vadd.f32 %v218_v5, %v216_v6 }
  0xe9   :  { %220 = vst [vmem:[#allocation4] sm:$0x1] %v219_v7 }
  0xea   :  { %231 = dma.vmem_to_hbm [thread:$0]  %s227_s2, 16, %s229_s25, [#allocation5]  }
  0xeb   :  { %335 = dma.done.wait [#allocation5], 16  }
  0xec   :  { %336 = vsyncadd [#allocation5], 4294967280 }
  0xed   :  { %236 = vsyncpa [#allocation5], 1 }

// kernel: tpu_custom_call.1
= control target key start
LH: loop header
LB: loop body
LE: loop exit
PB: predicated region body
PF: predicated region fallthrough
CT: control target
= control target key end

     0   :  { %vm71_vm0 = vcmask 130048   ;;  %s528_s0 = inlined_call_operand.vmem [shape: f32[128,16], index: 0, kind: input, shape index: {}]   ;;  %s529_s1 = inlined_call_operand.vmem [shape: f32[32,16], index: 1, kind: input, shape index: {}]   ;;  %s530_s2 = inlined_call_operand.vmem [shape: f32[32,1], index: 2, kind: input, shape index: {}]   ;;  %s531_s3 = inlined_call_operand.vmem [shape: f32[32,1], index: 3, kind: input, shape index: {}]   ;;  %s532_s4 = inlined_call_operand.<no memory space> [shape: f32[1,1], index: 4, kind: input, shape index: {}]   ;;  %s533_s5 = inlined_call_operand.hbm [shape: f32[1,128], index: 5, kind: output, shape index: {}]  }
   0x1   :  { %v46_v0 = vld [vmem:[%s528_s0 + $0x78] sm:$0xff]  ;;  %v45_v1 = vld [vmem:[%s528_s0 + $0x70] sm:$0xff] }
   0x2   :  { %237 = vmatpush.xpose.msk.msra.mxu0 %vm71_vm0, %v46_v0  ;;  %257 = vmatpush.xpose.msk.msra.mxu1 %vm71_vm0, %v46_v0 }
   0x3   :  { %258 = vmatpush.xpose.msk.msra.mxu2 %vm71_vm0, %v46_v0  ;;  %259 = vmatpush.xpose.msk.msra.mxu3 %vm71_vm0, %v46_v0 }
   0x4   :  { %11 = vsyncpa [#allocation5], 0  ;;  %v44_v2 = vld [vmem:[%s528_s0 + $0x68] sm:$0xff]  ;;  %v43_v3 = vld [vmem:[%s528_s0 + $0x60] sm:$0xff]  ;;  %v337_v6 = vmov 0   ;;  %v338_v29 = vmov 0.0  }
   0x5   :  { %v42_v4 = vld [vmem:[%s528_s0 + $0x58] sm:$0xff]  ;;  %v41_v5 = vld [vmem:[%s528_s0 + $0x50] sm:$0xff]  ;;  %308 = vset.pattern.permute.xlu0 %v337_v6  ;;  %309 = vset.pattern.permute.xlu1 %v337_v6  ;;  %v40_v7 = vld [vmem:[%s528_s0 + $0x48] sm:$0xff]  ;;  %26 = vst [vmem:[#allocation2] sm:$0x1] %v338_v29  ;;  %s339_s22 = smov [#allocation4]  }
   0x6   :  { %238 = vmatpush.xpose.msk.msra.mxu0 %vm71_vm0, %v45_v1  ;;  %260 = vmatpush.xpose.msk.msra.mxu1 %vm71_vm0, %v45_v1  ;;  %v47_v8 = vld [vmem:[%s530_s2] sm:$0xff]  ;;  %v49_v9 = vld [vmem:[%s530_s2 + $0x10] sm:$0xff]  ;;  %v38_v11 = vld [vmem:[%s528_s0 + $0x38] sm:$0xff]  ;;  %s228_s25 = sshll.u32 %s533_s5, 4  ;;  %s229_s25 = int_to_ptr.hbm [resolvable:$true] %s228_s25 }
   0x7   :  { %261 = vmatpush.xpose.msk.msra.mxu2 %vm71_vm0, %v45_v1  ;;  %262 = vmatpush.xpose.msk.msra.mxu3 %vm71_vm0, %v45_v1  ;;  %v39_v10 = vld [vmem:[%s528_s0 + $0x40] sm:$0xff]  ;;  %v48_v12 = vld [vmem:[%s530_s2 + $0x8] sm:$0xff]  ;;  %v50_v13 = vld [vmem:[%s530_s2 + $0x18] sm:$0xff]  ;;  %s226_s2 = sshll.u32 %s339_s22, 4  ;;  %s227_s2 = int_to_ptr.vmem [resolvable:$true] %s226_s2 }
   0x8   :  { %310 = vset.pattern.permute.xlu2 %v337_v6  ;;  %53 = vperm.xlu0 %308, %v47_v8   ;;  %v174_v14 = vld [vmem:[%s531_s3] sm:$0xff]  ;;  %v37_v15 = vld [vmem:[%s528_s0 + $0x30] sm:$0xff]  ;;  %v177_v17 = vld [vmem:[%s531_s3 + $0x18] sm:$0xff] }
   0x9   :  { %63 = vperm.xlu1 %309, %v49_v9   ;;  %180 = vperm.xlu2 %310, %v174_v14   ;;  %v176_v16 = vld [vmem:[%s531_s3 + $0x10] sm:$0xff]  ;;  %v36_v18 = vld [vmem:[%s528_s0 + $0x28] sm:$0xff]  ;;  %v35_v20 = vld [vmem:[%s528_s0 + $0x20] sm:$0xff] }
   0xa   :  { %239 = vmatpush.xpose.msk.msra.mxu0 %vm71_vm0, %v44_v2  ;;  %263 = vmatpush.xpose.msk.msra.mxu1 %vm71_vm0, %v44_v2  ;;  %v175_v19 = vld [vmem:[%s531_s3 + $0x8] sm:$0xff]  ;;  %v34_v21 = vld [vmem:[%s528_s0 + $0x18] sm:$0xff]  ;;  %v33_v22 = vld [vmem:[%s528_s0 + $0x10] sm:$0xff] }
   0xb   :  { %264 = vmatpush.xpose.msk.msra.mxu2 %vm71_vm0, %v44_v2  ;;  %265 = vmatpush.xpose.msk.msra.mxu3 %vm71_vm0, %v44_v2  ;;  %v32_v23 = vld [vmem:[%s528_s0 + $0x8] sm:$0xff]  ;;  %v31_v24 = vld [vmem:[%s528_s0] sm:$0xff]  ;;  %v29_v27 = vld [vmem:[%s529_s1 + $0x10] sm:$0xff] }
   0xc   :  { %v27_v25 = vld [vmem:[%s529_s1] sm:$0xff]  ;;  %v28_v26 = vld [vmem:[%s529_s1 + $0x8] sm:$0xff]  ;;  %v30_v28 = vld [vmem:[%s529_s1 + $0x18] sm:$0xff] }
   0xd   :  { %v173_v2 = vld [vmem:[#allocation2] sm:$0x1] }
   0xe   :  { %240 = vmatpush.xpose.msk.msra.mxu0 %vm71_vm0, %v43_v3  ;;  %266 = vmatpush.xpose.msk.msra.mxu1 %vm71_vm0, %v43_v3 }
   0xf   :  { %267 = vmatpush.xpose.msk.msra.mxu2 %vm71_vm0, %v43_v3  ;;  %268 = vmatpush.xpose.msk.msra.mxu3 %vm71_vm0, %v43_v3 }
  0x10   :  { %58 = vperm.xlu0 %308, %v48_v12  }
  0x11   :  { %68 = vperm.xlu1 %309, %v50_v13   ;;  %185 = vperm.xlu2 %310, %v175_v19  }
  0x12   :  { %241 = vmatpush.xpose.msk.msra.mxu0 %vm71_vm0, %v42_v4  ;;  %269 = vmatpush.xpose.msk.msra.mxu1 %vm71_vm0, %v42_v4 }
  0x13   :  { %270 = vmatpush.xpose.msk.msra.mxu2 %vm71_vm0, %v42_v4  ;;  %271 = vmatpush.xpose.msk.msra.mxu3 %vm71_vm0, %v42_v4 }
  0x16   :  { %242 = vmatpush.xpose.msk.msra.mxu0 %vm71_vm0, %v41_v5  ;;  %272 = vmatpush.xpose.msk.msra.mxu1 %vm71_vm0, %v41_v5 }
  0x17   :  { %273 = vmatpush.xpose.msk.msra.mxu2 %vm71_vm0, %v41_v5  ;;  %274 = vmatpush.xpose.msk.msra.mxu3 %vm71_vm0, %v41_v5  ;;  %v218_v5 = vstv %s532_s4 }
  0x18   :  { %190 = vperm.xlu0 %308, %v176_v16  }
  0x19   :  { %195 = vperm.xlu1 %309, %v177_v17  }
  0x1a   :  { %243 = vmatpush.xpose.msk.msra.mxu0 %vm71_vm0, %v40_v7  ;;  %275 = vmatpush.xpose.msk.msra.mxu1 %vm71_vm0, %v40_v7 }
  0x1b   :  { %276 = vmatpush.xpose.msk.msra.mxu2 %vm71_vm0, %v40_v7  ;;  %277 = vmatpush.xpose.msk.msra.mxu3 %vm71_vm0, %v40_v7 }
  0x1e   :  { %244 = vmatpush.xpose.msk.msra.mxu0 %vm71_vm0, %v39_v10  ;;  %278 = vmatpush.xpose.msk.msra.mxu1 %vm71_vm0, %v39_v10 }
  0x1f   :  { %279 = vmatpush.xpose.msk.msra.mxu2 %vm71_vm0, %v39_v10  ;;  %280 = vmatpush.xpose.msk.msra.mxu3 %vm71_vm0, %v39_v10 }
  0x22   :  { %245 = vmatpush.xpose.msk.msra.mxu0 %vm71_vm0, %v38_v11  ;;  %281 = vmatpush.xpose.msk.msra.mxu1 %vm71_vm0, %v38_v11 }
  0x23   :  { %282 = vmatpush.xpose.msk.msra.mxu2 %vm71_vm0, %v38_v11  ;;  %283 = vmatpush.xpose.msk.msra.mxu3 %vm71_vm0, %v38_v11 }
  0x26   :  { %246 = vmatpush.xpose.msk.msra.mxu0 %vm71_vm0, %v37_v15  ;;  %284 = vmatpush.xpose.msk.msra.mxu1 %vm71_vm0, %v37_v15 }
  0x27   :  { %285 = vmatpush.xpose.msk.msra.mxu2 %vm71_vm0, %v37_v15  ;;  %286 = vmatpush.xpose.msk.msra.mxu3 %vm71_vm0, %v37_v15 }
  0x2a   :  { %247 = vmatpush.xpose.msk.msra.mxu0 %vm71_vm0, %v36_v18  ;;  %287 = vmatpush.xpose.msk.msra.mxu1 %vm71_vm0, %v36_v18 }
  0x2b   :  { %288 = vmatpush.xpose.msk.msra.mxu2 %vm71_vm0, %v36_v18  ;;  %289 = vmatpush.xpose.msk.msra.mxu3 %vm71_vm0, %v36_v18 }
  0x2e   :  { %248 = vmatpush.xpose.msk.msra.mxu0 %vm71_vm0, %v35_v20  ;;  %290 = vmatpush.xpose.msk.msra.mxu1 %vm71_vm0, %v35_v20 }
  0x2f   :  { %291 = vmatpush.xpose.msk.msra.mxu2 %vm71_vm0, %v35_v20  ;;  %292 = vmatpush.xpose.msk.msra.mxu3 %vm71_vm0, %v35_v20 }
  0x32   :  { %249 = vmatpush.xpose.msk.msra.mxu0 %vm71_vm0, %v34_v21  ;;  %293 = vmatpush.xpose.msk.msra.mxu1 %vm71_vm0, %v34_v21 }
  0x33   :  { %294 = vmatpush.xpose.msk.msra.mxu2 %vm71_vm0, %v34_v21  ;;  %295 = vmatpush.xpose.msk.msra.mxu3 %vm71_vm0, %v34_v21 }
  0x36   :  { %250 = vmatpush.xpose.msk.msra.mxu0 %vm71_vm0, %v33_v22  ;;  %296 = vmatpush.xpose.msk.msra.mxu1 %vm71_vm0, %v33_v22 }
  0x37   :  { %297 = vmatpush.xpose.msk.msra.mxu2 %vm71_vm0, %v33_v22  ;;  %298 = vmatpush.xpose.msk.msra.mxu3 %vm71_vm0, %v33_v22 }
  0x3a   :  { %251 = vmatpush.xpose.msk.msra.mxu0 %vm71_vm0, %v32_v23  ;;  %299 = vmatpush.xpose.msk.msra.mxu1 %vm71_vm0, %v32_v23 }
  0x3b   :  { %300 = vmatpush.xpose.msk.msra.mxu2 %vm71_vm0, %v32_v23  ;;  %301 = vmatpush.xpose.msk.msra.mxu3 %vm71_vm0, %v32_v23 }
  0x3e   :  { %252 = vmatpush.xpose.msk.msra.mxu0 %vm71_vm0, %v31_v24  ;;  %302 = vmatpush.xpose.msk.msra.mxu1 %vm71_vm0, %v31_v24 }
  0x3f   :  { %303 = vmatpush.xpose.msk.msra.mxu2 %vm71_vm0, %v31_v24  ;;  %304 = vmatpush.xpose.msk.msra.mxu3 %vm71_vm0, %v31_v24 }
  0x41   :  { %253 = vmatmul.msk.f32.vlgmr.msra.gmra.mxu0 %vm71_vm0, %v27_v25  ;;  %254 = vmatmul.msk.f32.vlgmr.msra.gmra.mxu1 %vm71_vm0, %v28_v26 }
  0x42   :  { %255 = vmatmul.msk.f32.vlgmr.msra.gmra.mxu2 %vm71_vm0, %v29_v27  ;;  %256 = vmatmul.msk.f32.vlgmr.msra.gmra.mxu3 %vm71_vm0, %v30_v28 }
  0x63   :  { %v181_v32 = vpop.permute.xlu2 %180 }
  0x6b   :  { %v186_v45 = vpop.permute.xlu2 %185 }
  0x7a   :  { %v54_v30 = vpop.permute.xlu0 %53 }
  0x7b   :  { %v64_v31 = vpop.permute.xlu1 %63 }
  0x82   :  { %v59_v33 = vpop.permute.xlu0 %58 }
  0x83   :  { %v69_v40 = vpop.permute.xlu1 %68 }
  0x8a   :  { %v191_v52 = vpop.permute.xlu0 %190 }
  0x8b   :  { %v196_v57 = vpop.permute.xlu1 %195 }
  0xbe   :  { %v149_v34 = vpop.f32.mrf.mxu0  ;;  %v152_v35 = vpop.f32.mrf.mxu1 }
  0xbf   :  { %v150_v36 = vadd.f32 %v149_v34, %v54_v30  ;;  %v153_v37 = vadd.f32 %v152_v35, %v59_v33 }
  0xc1   :  { %vm161_vm1 = vcmp.gt.f32.partialorder %v150_v36, 0.0  ;;  %v165_v38 = vmul.f32 0.01, %v150_v36  ;;  %v166_v39 = vmul.f32 0.01, %v153_v37  ;;  %vm162_vm2 = vcmp.gt.f32.partialorder %v153_v37, 0.0 }
  0xc3   :  { %v169_v41 = vsel %vm161_vm1, %v150_v36, %v165_v38  ;;  %v170_v42 = vsel %vm162_vm2, %v153_v37, %v166_v39 }
  0xc4   :  { %v198_v48 = vmul.f32 %v181_v32, %v169_v41  ;;  %v199_v49 = vmul.f32 %v186_v45, %v170_v42 }
  0xc5   :  { %v155_v43 = vpop.f32.mrf.mxu2  ;;  %v158_v44 = vpop.f32.mrf.mxu3 }
  0xc6   :  { %v156_v46 = vadd.f32 %v155_v43, %v64_v31  ;;  %v159_v47 = vadd.f32 %v158_v44, %v69_v40  ;;  %v202_v55 = vadd.f32 %v199_v49, %v198_v48 }
  0xc8   :  { %vm163_vm3 = vcmp.gt.f32.partialorder %v156_v46, 0.0  ;;  %v167_v50 = vmul.f32 0.01, %v156_v46  ;;  %vm164_vm4 = vcmp.gt.f32.partialorder %v159_v47, 0.0  ;;  %v168_v51 = vmul.f32 0.01, %v159_v47 }
  0xca   :  { %v171_v53 = vsel %vm163_vm3, %v156_v46, %v167_v50  ;;  %v172_v54 = vsel %vm164_vm4, %v159_v47, %v168_v51 }
  0xcb   :  { %v200_v56 = vmul.f32 %v191_v52, %v171_v53  ;;  %v201_v59 = vmul.f32 %v196_v57, %v172_v54 }
  0xcd   :  { %v203_v58 = vadd.f32 %v202_v55, %v200_v56 }
  0xcf   :  { %v204_v60 = vadd.f32 %v203_v58, %v201_v59 }
  0xd1   :  { %v205_v61 = vrot.slane %v204_v60, 4 }
  0xd3   :  { %v206_v62 = vadd.f32 %v205_v61, %v204_v60 }
  0xd5   :  { %v207_v63 = vrot.slane %v206_v62, 2 }
  0xd7   :  { %v208_v0 = vadd.f32 %v207_v63, %v206_v62 }
  0xd9   :  { %v209_v1 = vrot.slane %v208_v0, 1 }
  0xdb   :  { %v210_v3 = vadd.f32 %v209_v1, %v208_v0 }
  0xdd   :  { %v211_v4 = vadd.f32 %v210_v3, %v173_v2 }
  0xdf   :  { %212 = vst [vmem:[#allocation2] sm:$0x1] %v211_v4 }
  0xe6   :  { %v216_v6 = vld [vmem:[#allocation2] sm:$0x1] }
  0xe7   :  { %v219_v7 = vadd.f32 %v218_v5, %v216_v6 }
  0xe9   :  { %220 = vst [vmem:[#allocation4] sm:$0x1] %v219_v7 }
  0xea   :  { %231 = dma.vmem_to_hbm [thread:$0]  %s227_s2, 16, %s229_s25, [#allocation5]  }
  0xeb   :  { %335 = dma.done.wait [#allocation5], 16  }
  0xec   :  { %336 = vsyncadd [#allocation5], 4294967280 }
  0xed   :  { %236 = vsyncpa [#allocation5], 1 }

</bundles_post_ra>
